<compile_context>
chip_gen: v7x
topology: tpu7x:2x2x1
jax: 0.10.0
libtpu: 0.0.40
codegen_flags: <defaults>
</compile_context>

<pallas_src>
import jax
import jax.numpy as jnp
from jax import lax
from jax.experimental import pallas as pl
from jax.experimental.pallas import tpu as pltpu


def _round_up(x: int, m: int) -> int:
    return ((x + m - 1) // m) * m


def _vmem_limit_bytes(nbytes: int) -> int:
    # generous headroom, clamped to a range that is safe on v5e / v6e / v7x
    return int(min(max(2 * nbytes + (4 << 20), 16 << 20), 48 << 20))


# -----------------------------------------------------------------------------
# Kernel 1: RNN(tanh) recurrence, time-major, batch-tiled.
# -----------------------------------------------------------------------------
def _rnn_recurrence_kernel(emb_ref, w_ih_t_ref, w_hh_t_ref, b_ref, hs_ref):
    """emb_ref: (L, tb, Ep)   w_ih_t_ref: (Ep, Hp)   w_hh_t_ref: (Hp, Hp)
    b_ref: (1, Hp)  (b_ih + b_hh folded once)
    hs_ref: (L, tb, Hp) output; first holds the input projection, then is
    overwritten in place with the hidden states."""
    L, tb, Ep = emb_ref.shape
    Hp = w_hh_t_ref.shape[0]

    # (1) Input projection for all timesteps in a single big MXU matmul.
    x = emb_ref[...].reshape(L * tb, Ep)
    xw = jnp.dot(x, w_ih_t_ref[...], preferred_element_type=jnp.float32) + b_ref[...]
    hs_ref[...] = xw.reshape(L, tb, Hp)

    # (2) Serial recurrence. Hidden state lives in the fori_loop carry (vregs).
    w_hh_t = w_hh_t_ref[...]

    def step(t, h_prev):
        pre = hs_ref[t] + jnp.dot(h_prev.astype(w_hh_t.dtype), w_hh_t,
                                  preferred_element_type=jnp.float32)
        h_new = jnp.tanh(pre)
        hs_ref[t] = h_new
        return h_new

    h0 = jnp.zeros((tb, Hp), jnp.float32)   # PyTorch default: h_0 = 0
    lax.fori_loop(0, L, step, h0, unroll=(L if L <= 16 else 4))


def _rnn_recurrence(emb_t, w_ih_t, w_hh_t, b_rec, *, tb):
    L, B_pad, E_pad = emb_t.shape
    Hp = w_hh_t.shape[0]
    grid = (B_pad // tb,)

    blk_bytes = (2 * L * tb * E_pad * emb_t.dtype.itemsize   # double-buffered input tile
                 + 2 * L * tb * Hp * 4                       # double-buffered output tile
                 + (E_pad * Hp + Hp * Hp) * w_ih_t.dtype.itemsize
                 + Hp * 4)
    cost = pl.CostEstimate(
        flops=2 * L * B_pad * E_pad * Hp + 2 * L * B_pad * Hp * Hp,
        transcendentals=L * B_pad * Hp,
        bytes_accessed=int(emb_t.size * emb_t.dtype.itemsize
                           + (w_ih_t.size + w_hh_t.size) * w_ih_t.dtype.itemsize
                           + b_rec.size * 4
                           + L * B_pad * Hp * 4))
    return pl.pallas_call(
        _rnn_recurrence_kernel,
        out_shape=jax.ShapeDtypeStruct((L, B_pad, Hp), jnp.float32),
        grid=grid,
        in_specs=[
            pl.BlockSpec((L, tb, E_pad), lambda i: (0, i, 0)),
            pl.BlockSpec((E_pad, Hp), lambda i: (0, 0)),
            pl.BlockSpec((Hp, Hp), lambda i: (0, 0)),
            pl.BlockSpec((1, Hp), lambda i: (0, 0)),
        ],
        out_specs=pl.BlockSpec((L, tb, Hp), lambda i: (0, i, 0)),
        compiler_params=pltpu.CompilerParams(
            dimension_semantics=("parallel",),
            vmem_limit_bytes=_vmem_limit_bytes(blk_bytes)),
        cost_estimate=cost,
    )(emb_t, w_ih_t, w_hh_t, b_rec)


# -----------------------------------------------------------------------------
# Kernel 2: output projection, grid-tiled (B*L, H) @ (H, V) + b.
# -----------------------------------------------------------------------------
def _proj_kernel(hs_ref, w_ref, b_ref, out_ref):
    out_ref[...] = (
        jnp.dot(hs_ref[...].astype(w_ref.dtype), w_ref[...],
                preferred_element_type=jnp.float32)
        + b_ref[...])


def _output_projection(hs_bm, w_out_t, b_out, *, tm, tn):
    M_pad, Hp = hs_bm.shape
    V_pad = w_out_t.shape[1]
    grid = (M_pad // tm, V_pad // tn)
    tile_bytes = 2 * 4 * (tm * Hp + Hp * tn + tn + tm * tn)   # ~double-buffered tiles
    cost = pl.CostEstimate(
        flops=2 * M_pad * Hp * V_pad,
        transcendentals=0,
        bytes_accessed=int(hs_bm.size * hs_bm.dtype.itemsize
                           + w_out_t.size * w_out_t.dtype.itemsize
                           + b_out.size * 4
                           + M_pad * V_pad * 4))
    return pl.pallas_call(
        _proj_kernel,
        out_shape=jax.ShapeDtypeStruct((M_pad, V_pad), jnp.float32),
        grid=grid,
        in_specs=[
            pl.BlockSpec((tm, Hp), lambda i, j: (i, 0)),
            pl.BlockSpec((Hp, tn), lambda i, j: (0, j)),
            pl.BlockSpec((1, tn), lambda i, j: (0, j)),
        ],
        out_specs=pl.BlockSpec((tm, tn), lambda i, j: (i, j)),
        compiler_params=pltpu.CompilerParams(
            dimension_semantics=("parallel", "parallel"),
            vmem_limit_bytes=_vmem_limit_bytes(tile_bytes)),
        cost_estimate=cost,
    )(hs_bm, w_out_t, b_out)


# -----------------------------------------------------------------------------
# Forward pass wrapper (matches LanguageModel.forward semantics)
# -----------------------------------------------------------------------------
def language_model_forward(indices, lengths, params, *, param_dtype=jnp.float32):
    """indices: (B, L) int32, lengths: (B,) int32 (unused, like the torch forward).
    Returns logits (B, L, vocab_size) float32.
    param_dtype=jnp.bfloat16 halves weight traffic on v6e/v7x (f32 accumulation)."""
    del lengths  # not used by the reference forward pass

    emb_tbl = params["embedding"]
    w_ih, w_hh = params["w_ih"], params["w_hh"]
    b_ih, b_hh = params["b_ih"], params["b_hh"]
    w_out, b_out = params["w_out"], params["b_out"]

    B, L = indices.shape
    V, E = emb_tbl.shape
    H = w_hh.shape[0]
    f32 = jnp.float32

    # ---- hardware-aligned padded sizes (zero padding preserves semantics) ----
    B_pad = _round_up(B, 8)          # f32 sublane
    if B_pad > 128:                  # batch-tile the recurrence (megacore-splittable)
        tb = 128
        B_pad = _round_up(B_pad, tb)
    else:
        tb = B_pad
    E_pad = _round_up(E, 128)        # lane
    H_pad = _round_up(H, 128)        # lane
    M = B * L
    tm = 256 if M >= 256 else _round_up(M, 8)
    M_pad = _round_up(M, tm)
    tn = 512 if V >= 512 else _round_up(V, 128)
    V_pad = _round_up(V, tn)

    # ---- padded / transposed parameters ----
    emb_tbl_p = jnp.pad(emb_tbl, ((0, 0), (0, E_pad - E))).astype(param_dtype)
    w_ih_t = jnp.pad(w_ih.T, ((0, E_pad - E), (0, H_pad - H))).astype(param_dtype)   # (E_pad, H_pad)
    w_hh_t = jnp.pad(w_hh.T, ((0, H_pad - H), (0, H_pad - H))).astype(param_dtype)   # (H_pad, H_pad)
    b_rec = jnp.pad((b_ih + b_hh).astype(f32), (0, H_pad - H))[None, :]              # (1, H_pad)
    w_out_t = jnp.pad(w_out.T, ((0, H_pad - H), (0, V_pad - V))).astype(param_dtype)  # (H_pad, V_pad)
    b_out_p = jnp.pad(b_out.astype(f32), (0, V_pad - V))[None, :]                     # (1, V_pad)

    # ---- time-major embedding gather (no separate activation transpose pass) ----
    # TODO(synk): the gather stays in XLA; an in-kernel scalar-prefetch gather would
    # only pay off for very large embedding tables.
    emb_t = jnp.take(emb_tbl_p, indices.T, axis=0)          # (L, B, E_pad)
    if B_pad != B:
        emb_t = jnp.pad(emb_t, ((0, 0), (0, B_pad - B), (0, 0)))

    # ---- kernel 1: recurrence ----
    hs = _rnn_recurrence(emb_t, w_ih_t, w_hh_t, b_rec, tb=tb)   # (L, B_pad, H_pad) f32

    # ---- re-layout batch-major BEFORE the projection (H-wide, cheap) so logits
    #      come out directly as (B, L, V) with no V-wide transpose afterwards ----
    hs_bm = jnp.transpose(hs[:, :B, :], (1, 0, 2)).reshape(M, H_pad)
    if M_pad != M:
        hs_bm = jnp.pad(hs_bm, ((0, M_pad - M), (0, 0)))

    # ---- kernel 2: tiled output projection ----
    logits = _output_projection(hs_bm, w_out_t, b_out_p, tm=tm, tn=tn)   # (M_pad, V_pad)
    return logits[:M, :V].reshape(B, L, V)


def init_params(key, vocab_size, embed_size, hidden_size, pad_id):
    """Deterministic init mirroring the PyTorch module's parameter shapes."""
    ks = jax.random.split(key, 7)
    k = 1.0 / jnp.sqrt(hidden_size)
    emb = jax.random.normal(ks[0], (vocab_size, embed_size), jnp.float32)
    emb = emb.at[pad_id].set(0.0)  # nn.Embedding(padding_idx=pad_id)
    return {
        "embedding": emb,
        # nn.RNN(E, H): weight_ih_l0 (H, E), weight_hh_l0 (H, H)
        "w_ih": jax.random.uniform(ks[1], (hidden_size, embed_size), jnp.float32, -k, k),
        "w_hh": jax.random.uniform(ks[2], (hidden_size, hidden_size), jnp.float32, -k, k),
        "b_ih": jax.random.uniform(ks[3], (hidden_size,), jnp.float32, -k, k),
        "b_hh": jax.random.uniform(ks[4], (hidden_size,), jnp.float32, -k, k),
        # nn.Linear(H, V): weight (V, H), bias (V,)
        "w_out": jax.random.uniform(ks[5], (vocab_size, hidden_size), jnp.float32, -k, k),
        "b_out": jax.random.uniform(ks[6], (vocab_size,), jnp.float32, -k, k),
    }


def _reference_forward(indices, params):
    """Pure-JAX reference of the PyTorch forward() for a numerical sanity check."""
    emb = params["embedding"][indices]                       # (B, L, E)
    w_ih_t, w_hh_t = params["w_ih"].T, params["w_hh"].T

    def cell(h, x_t):
        h = jnp.tanh(x_t @ w_ih_t + params["b_ih"] + h @ w_hh_t + params["b_hh"])
        return h, h

    h0 = jnp.zeros((indices.shape[0], params["w_hh"].shape[0]), jnp.float32)
    _, hs = lax.scan(cell, h0, jnp.transpose(emb, (1, 0, 2)))   # (L, B, H)
    hs = jnp.transpose(hs, (1, 0, 2))                           # (B, L, H)
    return hs @ params["w_out"].T + params["b_out"]


# TODO(synk): the autoregressive `inference()` sampling loop is host-side generation
# logic and is not implemented as a kernel.

if __name__ == "__main__":
    # small, forward-consistent shapes
    batch, seq_len = 2, 8
    vocab_size, embed_size, hidden_size = 64, 32, 32
    pad_id = 0

    key = jax.random.PRNGKey(0)
    k_idx, k_par = jax.random.split(key)

    params = init_params(k_par, vocab_size, embed_size, hidden_size, pad_id)
    indices = jax.random.randint(k_idx, (batch, seq_len), 0, vocab_size, jnp.int32)
    lengths = jnp.full((batch,), seq_len, jnp.int32)

    forward = jax.jit(language_model_forward)
    logits = jax.block_until_ready(forward(indices, lengths, params))

    assert logits.shape == (batch, seq_len, vocab_size), logits.shape
    assert logits.dtype == jnp.float32
    assert bool(jnp.all(jnp.isfinite(logits)))

    ref = _reference_forward(indices, params)
    max_err = float(jnp.max(jnp.abs(logits - ref)))
    assert max_err < 5e-2, f"max abs error vs reference = {max_err}"

    print("KERNEL_OK")
</pallas_src>

<mosaic_0001>
module attributes {stable_mosaic.version = 11 : i64} {
  func.func @_proj_kernel(%arg0: i32, %arg1: i32, %arg2: memref<16x128xf32, #tpu.memory_space<vmem>>, %arg3: memref<128x128xf32, #tpu.memory_space<vmem>>, %arg4: memref<1x128xf32, #tpu.memory_space<vmem>>, %arg5: memref<16x128xf32, #tpu.memory_space<vmem>>) attributes {dimension_semantics = [#tpu.dimension_semantics<parallel>, #tpu.dimension_semantics<parallel>], iteration_bounds = array<i64: 1, 1>, scalar_prefetch = 0 : i64, scratch_operands = 0 : i64, tpu.core_type = #tpu.core_type<tc>, window_params = [{transform_indices = @transform_0, window_bounds = array<i64: 16, 128>}, {transform_indices = @transform_1, window_bounds = array<i64: 128, 128>}, {transform_indices = @transform_2, window_bounds = array<i64: 1, 128>}, {transform_indices = @transform_3, window_bounds = array<i64: 16, 128>}]} {
    %c0 = arith.constant 0 : index
    %c0_0 = arith.constant 0 : index
    %0 = vector.load %arg2[%c0, %c0_0] : memref<16x128xf32, #tpu.memory_space<vmem>>, vector<16x128xf32>
    %c0_1 = arith.constant 0 : index
    %c0_2 = arith.constant 0 : index
    %1 = vector.load %arg3[%c0_1, %c0_2] : memref<128x128xf32, #tpu.memory_space<vmem>>, vector<128x128xf32>
    %cst = arith.constant dense<0.000000e+00> : vector<16x128xf32>
    %2 = tpu.matmul %0, %1, %cst {dimension_numbers = #tpu.dot_dimension_numbers<[1], [0], [0], [1], [0, 0, 1, 1], [], []>} : vector<16x128xf32>, vector<128x128xf32>, vector<16x128xf32> -> vector<16x128xf32>
    %c0_3 = arith.constant 0 : index
    %c0_4 = arith.constant 0 : index
    %3 = vector.load %arg4[%c0_3, %c0_4] : memref<1x128xf32, #tpu.memory_space<vmem>>, vector<1x128xf32>
    %4 = vector.broadcast %3 : vector<1x128xf32> to vector<16x128xf32>
    %5 = arith.addf %2, %4 : vector<16x128xf32>
    %c0_5 = arith.constant 0 : index
    %c0_6 = arith.constant 0 : index
    %6 = vector.load %arg5[%c0_5, %c0_6] : memref<16x128xf32, #tpu.memory_space<vmem>>, vector<16x128xf32>
    tpu.vector_store %arg5[%c0_5, %c0_6], %5 {strides = array<i32>} : memref<16x128xf32, #tpu.memory_space<vmem>>, vector<16x128xf32>,
    return
  }
  func.func @transform_0(%arg0: i32, %arg1: i32) -> (i32, i32) {
    %c0_i32 = arith.constant 0 : i32
    %c0_i32_0 = arith.constant 0 : i32
    return %arg0, %c0_i32 : i32, i32
  }
  func.func @transform_1(%arg0: i32, %arg1: i32) -> (i32, i32) {
    %c0_i32 = arith.constant 0 : i32
    %c0_i32_0 = arith.constant 0 : i32
    return %c0_i32, %arg1 : i32, i32
  }
  func.func @transform_2(%arg0: i32, %arg1: i32) -> (i32, i32) {
    %c0_i32 = arith.constant 0 : i32
    %c0_i32_0 = arith.constant 0 : i32
    return %c0_i32, %arg1 : i32, i32
  }
  func.func @transform_3(%arg0: i32, %arg1: i32) -> (i32, i32) {
    %c0_i32 = arith.constant 0 : i32
    return %arg0, %arg1 : i32, i32
  }
}

module attributes {stable_mosaic.version = 11 : i64} {
  func.func @_rnn_recurrence_kernel(%arg0: i32, %arg1: memref<8x8x128xf32, #tpu.memory_space<vmem>>, %arg2: memref<128x128xf32, #tpu.memory_space<vmem>>, %arg3: memref<128x128xf32, #tpu.memory_space<vmem>>, %arg4: memref<1x128xf32, #tpu.memory_space<vmem>>, %arg5: memref<8x8x128xf32, #tpu.memory_space<vmem>>) attributes {dimension_semantics = [#tpu.dimension_semantics<parallel>], iteration_bounds = array<i64: 1>, scalar_prefetch = 0 : i64, scratch_operands = 0 : i64, tpu.core_type = #tpu.core_type<tc>, window_params = [{transform_indices = @transform_0, window_bounds = array<i64: 8, 8, 128>}, {pipeline_mode = #tpu.pipeline_mode<synchronous>, transform_indices = @transform_1, window_bounds = array<i64: 128, 128>}, {pipeline_mode = #tpu.pipeline_mode<synchronous>, transform_indices = @transform_2, window_bounds = array<i64: 128, 128>}, {pipeline_mode = #tpu.pipeline_mode<synchronous>, transform_indices = @transform_3, window_bounds = array<i64: 1, 128>}, {transform_indices = @transform_4, window_bounds = array<i64: 8, 8, 128>}]} {
    %c0 = arith.constant 0 : index
    %c0_0 = arith.constant 0 : index
    %c0_1 = arith.constant 0 : index
    %0 = vector.load %arg1[%c0, %c0_0, %c0_1] : memref<8x8x128xf32, #tpu.memory_space<vmem>>, vector<8x8x128xf32>
    %1 = vector.shape_cast %0 : vector<8x8x128xf32> to vector<64x128xf32>
    %c0_2 = arith.constant 0 : index
    %c0_3 = arith.constant 0 : index
    %2 = vector.load %arg2[%c0_2, %c0_3] : memref<128x128xf32, #tpu.memory_space<vmem>>, vector<128x128xf32>
    %cst = arith.constant dense<0.000000e+00> : vector<64x128xf32>
    %3 = tpu.matmul %1, %2, %cst {dimension_numbers = #tpu.dot_dimension_numbers<[1], [0], [0], [1], [0, 0, 1, 1], [], []>} : vector<64x128xf32>, vector<128x128xf32>, vector<64x128xf32> -> vector<64x128xf32>
    %c0_4 = arith.constant 0 : index
    %c0_5 = arith.constant 0 : index
    %4 = vector.load %arg4[%c0_4, %c0_5] : memref<1x128xf32, #tpu.memory_space<vmem>>, vector<1x128xf32>
    %5 = vector.broadcast %4 : vector<1x128xf32> to vector<64x128xf32>
    %6 = arith.addf %3, %5 : vector<64x128xf32>
    %7 = vector.shape_cast %6 : vector<64x128xf32> to vector<8x8x128xf32>
    %c0_6 = arith.constant 0 : index
    %c0_7 = arith.constant 0 : index
    %c0_8 = arith.constant 0 : index
    %8 = vector.load %arg5[%c0_6, %c0_7, %c0_8] : memref<8x8x128xf32, #tpu.memory_space<vmem>>, vector<8x8x128xf32>
    tpu.vector_store %arg5[%c0_6, %c0_7, %c0_8], %7 {strides = array<i32>} : memref<8x8x128xf32, #tpu.memory_space<vmem>>, vector<8x8x128xf32>,
    %c0_9 = arith.constant 0 : index
    %c0_10 = arith.constant 0 : index
    %9 = vector.load %arg3[%c0_9, %c0_10] : memref<128x128xf32, #tpu.memory_space<vmem>>, vector<128x128xf32>
    %cst_11 = arith.constant 0.000000e+00 : f32
    %10 = vector.broadcast %cst_11 : f32 to vector<8x128xf32>
    %c0_i32 = arith.constant 0 : i32
    %11 = arith.index_cast %c0_i32 : i32 to index
    %c0_12 = arith.constant 0 : index
    %c0_13 = arith.constant 0 : index
    %12 = vector.load %arg5[%11, %c0_12, %c0_13] : memref<8x8x128xf32, #tpu.memory_space<vmem>>, vector<1x8x128xf32>
    %13 = vector.shape_cast %12 : vector<1x8x128xf32> to vector<8x128xf32>
    %cst_14 = arith.constant dense<0.000000e+00> : vector<8x128xf32>
    %14 = tpu.matmul %10, %9, %cst_14 {dimension_numbers = #tpu.dot_dimension_numbers<[1], [0], [0], [1], [0, 0, 1, 1], [], []>} : vector<8x128xf32>, vector<128x128xf32>, vector<8x128xf32> -> vector<8x128xf32>
    %15 = arith.addf %13, %14 : vector<8x128xf32>
    %16 = math.tanh %15 : vector<8x128xf32>
    %17 = arith.index_cast %c0_i32 : i32 to index
    %c0_15 = arith.constant 0 : index
    %c0_16 = arith.constant 0 : index
    %18 = vector.load %arg5[%17, %c0_15, %c0_16] : memref<8x8x128xf32, #tpu.memory_space<vmem>>, vector<1x8x128xf32>
    %19 = vector.shape_cast %18 : vector<1x8x128xf32> to vector<8x128xf32>
    %20 = vector.shape_cast %16 : vector<8x128xf32> to vector<1x8x128xf32>
    tpu.vector_store %arg5[%17, %c0_15, %c0_16], %20 {strides = array<i32>} : memref<8x8x128xf32, #tpu.memory_space<vmem>>, vector<1x8x128xf32>,
    %c1_i32 = arith.constant 1 : i32
    %21 = arith.index_cast %c1_i32 : i32 to index
    %c0_17 = arith.constant 0 : index
    %c0_18 = arith.constant 0 : index
    %22 = vector.load %arg5[%21, %c0_17, %c0_18] : memref<8x8x128xf32, #tpu.memory_space<vmem>>, vector<1x8x128xf32>
    %23 = vector.shape_cast %22 : vector<1x8x128xf32> to vector<8x128xf32>
    %cst_19 = arith.constant dense<0.000000e+00> : vector<8x128xf32>
    %24 = tpu.matmul %16, %9, %cst_19 {dimension_numbers = #tpu.dot_dimension_numbers<[1], [0], [0], [1], [0, 0, 1, 1], [], []>} : vector<8x128xf32>, vector<128x128xf32>, vector<8x128xf32> -> vector<8x128xf32>
    %25 = arith.addf %23, %24 : vector<8x128xf32>
    %26 = math.tanh %25 : vector<8x128xf32>
    %27 = arith.index_cast %c1_i32 : i32 to index
    %c0_20 = arith.constant 0 : index
    %c0_21 = arith.constant 0 : index
    %28 = vector.load %arg5[%27, %c0_20, %c0_21] : memref<8x8x128xf32, #tpu.memory_space<vmem>>, vector<1x8x128xf32>
    %29 = vector.shape_cast %28 : vector<1x8x128xf32> to vector<8x128xf32>
    %30 = vector.shape_cast %26 : vector<8x128xf32> to vector<1x8x128xf32>
    tpu.vector_store %arg5[%27, %c0_20, %c0_21], %30 {strides = array<i32>} : memref<8x8x128xf32, #tpu.memory_space<vmem>>, vector<1x8x128xf32>,
    %c2_i32 = arith.constant 2 : i32
    %31 = arith.index_cast %c2_i32 : i32 to index
    %c0_22 = arith.constant 0 : index
    %c0_23 = arith.constant 0 : index
    %32 = vector.load %arg5[%31, %c0_22, %c0_23] : memref<8x8x128xf32, #tpu.memory_space<vmem>>, vector<1x8x128xf32>
    %33 = vector.shape_cast %32 : vector<1x8x128xf32> to vector<8x128xf32>
    %cst_24 = arith.constant dense<0.000000e+00> : vector<8x128xf32>
    %34 = tpu.matmul %26, %9, %cst_24 {dimension_numbers = #tpu.dot_dimension_numbers<[1], [0], [0], [1], [0, 0, 1, 1], [], []>} : vector<8x128xf32>, vector<128x128xf32>, vector<8x128xf32> -> vector<8x128xf32>
    %35 = arith.addf %33, %34 : vector<8x128xf32>
    %36 = math.tanh %35 : vector<8x128xf32>
    %37 = arith.index_cast %c2_i32 : i32 to index
    %c0_25 = arith.constant 0 : index
    %c0_26 = arith.constant 0 : index
    %38 = vector.load %arg5[%37, %c0_25, %c0_26] : memref<8x8x128xf32, #tpu.memory_space<vmem>>, vector<1x8x128xf32>
    %39 = vector.shape_cast %38 : vector<1x8x128xf32> to vector<8x128xf32>
    %40 = vector.shape_cast %36 : vector<8x128xf32> to vector<1x8x128xf32>
    tpu.vector_store %arg5[%37, %c0_25, %c0_26], %40 {strides = array<i32>} : memref<8x8x128xf32, #tpu.memory_space<vmem>>, vector<1x8x128xf32>,
    %c3_i32 = arith.constant 3 : i32
    %41 = arith.index_cast %c3_i32 : i32 to index
    %c0_27 = arith.constant 0 : index
    %c0_28 = arith.constant 0 : index
    %42 = vector.load %arg5[%41, %c0_27, %c0_28] : memref<8x8x128xf32, #tpu.memory_space<vmem>>, vector<1x8x128xf32>
    %43 = vector.shape_cast %42 : vector<1x8x128xf32> to vector<8x128xf32>
    %cst_29 = arith.constant dense<0.000000e+00> : vector<8x128xf32>
    %44 = tpu.matmul %36, %9, %cst_29 {dimension_numbers = #tpu.dot_dimension_numbers<[1], [0], [0], [1], [0, 0, 1, 1], [], []>} : vector<8x128xf32>, vector<128x128xf32>, vector<8x128xf32> -> vector<8x128xf32>
    %45 = arith.addf %43, %44 : vector<8x128xf32>
    %46 = math.tanh %45 : vector<8x128xf32>
    %47 = arith.index_cast %c3_i32 : i32 to index
    %c0_30 = arith.constant 0 : index
    %c0_31 = arith.constant 0 : index
    %48 = vector.load %arg5[%47, %c0_30, %c0_31] : memref<8x8x128xf32, #tpu.memory_space<vmem>>, vector<1x8x128xf32>
    %49 = vector.shape_cast %48 : vector<1x8x128xf32> to vector<8x128xf32>
    %50 = vector.shape_cast %46 : vector<8x128xf32> to vector<1x8x128xf32>
    tpu.vector_store %arg5[%47, %c0_30, %c0_31], %50 {strides = array<i32>} : memref<8x8x128xf32, #tpu.memory_space<vmem>>, vector<1x8x128xf32>,
    %c4_i32 = arith.constant 4 : i32
    %51 = arith.index_cast %c4_i32 : i32 to index
    %c0_32 = arith.constant 0 : index
    %c0_33 = arith.constant 0 : index
    %52 = vector.load %arg5[%51, %c0_32, %c0_33] : memref<8x8x128xf32, #tpu.memory_space<vmem>>, vector<1x8x128xf32>
    %53 = vector.shape_cast %52 : vector<1x8x128xf32> to vector<8x128xf32>
    %cst_34 = arith.constant dense<0.000000e+00> : vector<8x128xf32>
    %54 = tpu.matmul %46, %9, %cst_34 {dimension_numbers = #tpu.dot_dimension_numbers<[1], [0], [0], [1], [0, 0, 1, 1], [], []>} : vector<8x128xf32>, vector<128x128xf32>, vector<8x128xf32> -> vector<8x128xf32>
    %55 = arith.addf %53, %54 : vector<8x128xf32>
    %56 = math.tanh %55 : vector<8x128xf32>
    %57 = arith.index_cast %c4_i32 : i32 to index
    %c0_35 = arith.constant 0 : index
    %c0_36 = arith.constant 0 : index
    %58 = vector.load %arg5[%57, %c0_35, %c0_36] : memref<8x8x128xf32, #tpu.memory_space<vmem>>, vector<1x8x128xf32>
    %59 = vector.shape_cast %58 : vector<1x8x128xf32> to vector<8x128xf32>
    %60 = vector.shape_cast %56 : vector<8x128xf32> to vector<1x8x128xf32>
    tpu.vector_store %arg5[%57, %c0_35, %c0_36], %60 {strides = array<i32>} : memref<8x8x128xf32, #tpu.memory_space<vmem>>, vector<1x8x128xf32>,
    %c5_i32 = arith.constant 5 : i32
    %61 = arith.index_cast %c5_i32 : i32 to index
    %c0_37 = arith.constant 0 : index
    %c0_38 = arith.constant 0 : index
    %62 = vector.load %arg5[%61, %c0_37, %c0_38] : memref<8x8x128xf32, #tpu.memory_space<vmem>>, vector<1x8x128xf32>
    %63 = vector.shape_cast %62 : vector<1x8x128xf32> to vector<8x128xf32>
    %cst_39 = arith.constant dense<0.000000e+00> : vector<8x128xf32>
    %64 = tpu.matmul %56, %9, %cst_39 {dimension_numbers = #tpu.dot_dimension_numbers<[1], [0], [0], [1], [0, 0, 1, 1], [], []>} : vector<8x128xf32>, vector<128x128xf32>, vector<8x128xf32> -> vector<8x128xf32>
    %65 = arith.addf %63, %64 : vector<8x128xf32>
    %66 = math.tanh %65 : vector<8x128xf32>
    %67 = arith.index_cast %c5_i32 : i32 to index
    %c0_40 = arith.constant 0 : index
    %c0_41 = arith.constant 0 : index
    %68 = vector.load %arg5[%67, %c0_40, %c0_41] : memref<8x8x128xf32, #tpu.memory_space<vmem>>, vector<1x8x128xf32>
    %69 = vector.shape_cast %68 : vector<1x8x128xf32> to vector<8x128xf32>
    %70 = vector.shape_cast %66 : vector<8x128xf32> to vector<1x8x128xf32>
    tpu.vector_store %arg5[%67, %c0_40, %c0_41], %70 {strides = array<i32>} : memref<8x8x128xf32, #tpu.memory_space<vmem>>, vector<1x8x128xf32>,
    %c6_i32 = arith.constant 6 : i32
    %71 = arith.index_cast %c6_i32 : i32 to index
    %c0_42 = arith.constant 0 : index
    %c0_43 = arith.constant 0 : index
    %72 = vector.load %arg5[%71, %c0_42, %c0_43] : memref<8x8x128xf32, #tpu.memory_space<vmem>>, vector<1x8x128xf32>
    %73 = vector.shape_cast %72 : vector<1x8x128xf32> to vector<8x128xf32>
    %cst_44 = arith.constant dense<0.000000e+00> : vector<8x128xf32>
    %74 = tpu.matmul %66, %9, %cst_44 {dimension_numbers = #tpu.dot_dimension_numbers<[1], [0], [0], [1], [0, 0, 1, 1], [], []>} : vector<8x128xf32>, vector<128x128xf32>, vector<8x128xf32> -> vector<8x128xf32>
    %75 = arith.addf %73, %74 : vector<8x128xf32>
    %76 = math.tanh %75 : vector<8x128xf32>
    %77 = arith.index_cast %c6_i32 : i32 to index
    %c0_45 = arith.constant 0 : index
    %c0_46 = arith.constant 0 : index
    %78 = vector.load %arg5[%77, %c0_45, %c0_46] : memref<8x8x128xf32, #tpu.memory_space<vmem>>, vector<1x8x128xf32>
    %79 = vector.shape_cast %78 : vector<1x8x128xf32> to vector<8x128xf32>
    %80 = vector.shape_cast %76 : vector<8x128xf32> to vector<1x8x128xf32>
    tpu.vector_store %arg5[%77, %c0_45, %c0_46], %80 {strides = array<i32>} : memref<8x8x128xf32, #tpu.memory_space<vmem>>, vector<1x8x128xf32>,
    %c7_i32 = arith.constant 7 : i32
    %81 = arith.index_cast %c7_i32 : i32 to index
    %c0_47 = arith.constant 0 : index
    %c0_48 = arith.constant 0 : index
    %82 = vector.load %arg5[%81, %c0_47, %c0_48] : memref<8x8x128xf32, #tpu.memory_space<vmem>>, vector<1x8x128xf32>
    %83 = vector.shape_cast %82 : vector<1x8x128xf32> to vector<8x128xf32>
    %cst_49 = arith.constant dense<0.000000e+00> : vector<8x128xf32>
    %84 = tpu.matmul %76, %9, %cst_49 {dimension_numbers = #tpu.dot_dimension_numbers<[1], [0], [0], [1], [0, 0, 1, 1], [], []>} : vector<8x128xf32>, vector<128x128xf32>, vector<8x128xf32> -> vector<8x128xf32>
    %85 = arith.addf %83, %84 : vector<8x128xf32>
    %86 = math.tanh %85 : vector<8x128xf32>
    %87 = arith.index_cast %c7_i32 : i32 to index
    %c0_50 = arith.constant 0 : index
    %c0_51 = arith.constant 0 : index
    %88 = vector.load %arg5[%87, %c0_50, %c0_51] : memref<8x8x128xf32, #tpu.memory_space<vmem>>, vector<1x8x128xf32>
    %89 = vector.shape_cast %88 : vector<1x8x128xf32> to vector<8x128xf32>
    %90 = vector.shape_cast %86 : vector<8x128xf32> to vector<1x8x128xf32>
    tpu.vector_store %arg5[%87, %c0_50, %c0_51], %90 {strides = array<i32>} : memref<8x8x128xf32, #tpu.memory_space<vmem>>, vector<1x8x128xf32>,
    %c8_i32 = arith.constant 8 : i32
    return
  }
  func.func @transform_0(%arg0: i32) -> (i32, i32, i32) {
    %c0_i32 = arith.constant 0 : i32
    %c0_i32_0 = arith.constant 0 : i32
    %c0_i32_1 = arith.constant 0 : i32
    return %c0_i32, %arg0, %c0_i32_0 : i32, i32, i32
  }
  func.func @transform_1(%arg0: i32) -> (i32, i32) {
    %c0_i32 = arith.constant 0 : i32
    %c0_i32_0 = arith.constant 0 : i32
    %c0_i32_1 = arith.constant 0 : i32
    return %c0_i32, %c0_i32_0 : i32, i32
  }
  func.func @transform_2(%arg0: i32) -> (i32, i32) {
    %c0_i32 = arith.constant 0 : i32
    %c0_i32_0 = arith.constant 0 : i32
    %c0_i32_1 = arith.constant 0 : i32
    return %c0_i32, %c0_i32_0 : i32, i32
  }
  func.func @transform_3(%arg0: i32) -> (i32, i32) {
    %c0_i32 = arith.constant 0 : i32
    %c0_i32_0 = arith.constant 0 : i32
    %c0_i32_1 = arith.constant 0 : i32
    return %c0_i32, %c0_i32_0 : i32, i32
  }
  func.func @transform_4(%arg0: i32) -> (i32, i32, i32) {
    %c0_i32 = arith.constant 0 : i32
    %c0_i32_0 = arith.constant 0 : i32
    %c0_i32_1 = arith.constant 0 : i32
    return %c0_i32, %arg0, %c0_i32_0 : i32, i32, i32
  }
}

</mosaic_0001>

<bundles_post_ra>
// kernel: language_model_forward.3
= control target key start
LH: loop header
LB: loop body
LE: loop exit
PB: predicated region body
PF: predicated region fallthrough
CT: control target
= control target key end

     0   :  { %s289_s1 = inlined_call_operand.vmem [shape: f32[128,128], index: 1, kind: input, shape index: {}]   ;;  %s290_s0 = inlined_call_operand.vmem [shape: f32[16,128], index: 0, kind: input, shape index: {}]   ;;  %s291_s2 = inlined_call_operand.vmem [shape: f32[1,128], index: 2, kind: input, shape index: {}]   ;;  %s292_s3 = inlined_call_operand.vmem [shape: f32[16,128], index: 3, kind: output, shape index: {}]  }
   0x1   :  { %v16_v0 = vld [vmem:[%s289_s1] sm:$0xff]  ;;  %v17_v1 = vld [vmem:[%s289_s1 + $0x8] sm:$0xff]  ;;  %v18_v2 = vld [vmem:[%s289_s1 + $0x10] sm:$0xff] }
   0x2   :  { %v174_v3 = vpack.c.bf16 %v17_v1, %v16_v0  ;;  %v19_v4 = vld [vmem:[%s289_s1 + $0x18] sm:$0xff]  ;;  %v20_v6 = vld [vmem:[%s289_s1 + $0x20] sm:$0xff]  ;;  %v21_v7 = vld [vmem:[%s289_s1 + $0x28] sm:$0xff] }
   0x3   :  { %v178_v5 = vpack.c.bf16 %v19_v4, %v18_v2  ;;  %v182_v8 = vpack.c.bf16 %v21_v7, %v20_v6  ;;  %v14_v9 = vld [vmem:[%s290_s0] sm:$0xff]  ;;  %v22_v10 = vld [vmem:[%s289_s1 + $0x30] sm:$0xff]  ;;  %v23_v11 = vld [vmem:[%s289_s1 + $0x38] sm:$0xff] }
   0x4   :  { %175 = vmatprep.subr.bf16.mxu0 %v174_v3  ;;  %171 = vmatprep.mubr.f32.mxu0 %v14_v9  ;;  %v186_v12 = vpack.c.bf16 %v23_v11, %v22_v10  ;;  %v24_v13 = vld [vmem:[%s289_s1 + $0x40] sm:$0xff]  ;;  %v25_v14 = vld [vmem:[%s289_s1 + $0x48] sm:$0xff]  ;;  %v26_v16 = vld [vmem:[%s289_s1 + $0x50] sm:$0xff] }
   0x5   :  { %177 = vmatpush3.bf16.msra.mxu0 %v174_v3  ;;  %v190_v15 = vpack.c.bf16 %v25_v14, %v24_v13  ;;  %v27_v17 = vld [vmem:[%s289_s1 + $0x58] sm:$0xff]  ;;  %v28_v19 = vld [vmem:[%s289_s1 + $0x60] sm:$0xff]  ;;  %v29_v20 = vld [vmem:[%s289_s1 + $0x68] sm:$0xff] }
   0x6   :  { %179 = vmatprep.subr.bf16.mxu0 %v178_v5  ;;  %v194_v18 = vpack.c.bf16 %v27_v17, %v26_v16  ;;  %v198_v21 = vpack.c.bf16 %v29_v20, %v28_v19  ;;  %v30_v22 = vld [vmem:[%s289_s1 + $0x70] sm:$0xff]  ;;  %v31_v23 = vld [vmem:[%s289_s1 + $0x78] sm:$0xff]  ;;  %v15_v25 = vld [vmem:[%s290_s0 + $0x8] sm:$0xff] }
   0x7   :  { %v202_v24 = vpack.c.bf16 %v31_v23, %v30_v22  ;;  %v120_v26 = vld [vmem:[%s291_s2] ss:$0 sm:$0xff] }
   0x9   :  { %181 = vmatpush3.bf16.msra.mxu0 %v178_v5 }
   0xa   :  { %183 = vmatprep.subr.bf16.mxu0 %v182_v8 }
   0xd   :  { %185 = vmatpush3.bf16.msra.mxu0 %v182_v8 }
   0xe   :  { %187 = vmatprep.subr.bf16.mxu0 %v186_v12 }
  0x11   :  { %189 = vmatpush3.bf16.msra.mxu0 %v186_v12 }
  0x12   :  { %191 = vmatprep.subr.bf16.mxu0 %v190_v15 }
  0x15   :  { %193 = vmatpush3.bf16.msra.mxu0 %v190_v15 }
  0x16   :  { %195 = vmatprep.subr.bf16.mxu0 %v194_v18 }
  0x19   :  { %197 = vmatpush3.bf16.msra.mxu0 %v194_v18 }
  0x1a   :  { %199 = vmatprep.subr.bf16.mxu0 %v198_v21 }
  0x1d   :  { %201 = vmatpush3.bf16.msra.mxu0 %v198_v21 }
  0x1e   :  { %203 = vmatprep.subr.bf16.mxu0 %v202_v24 }
  0x21   :  { %205 = vmatpush3.bf16.msra.mxu0 %v202_v24 }
  0x24   :  { %172 = vmatmul.mubr.f32.vlgmr.msra.gmra.mrb[0].mxu0 %v15_v25 }
  0xf7   :  { %v173_v27 = vpop.f32.mrb[0].mxu0 }
  0xf8   :  { %v111_v28 = vadd.f32 %v173_v27, %v120_v26  ;;  %v105_v29 = vpop.f32.mrb[1].mxu0 }
  0xf9   :  { %v106_v30 = vadd.f32 %v120_v26, %v105_v29 }
  0xfa   :  { %115 = vst [vmem:[%s292_s3 + $0x8] sm:$0xff] %v111_v28 }
  0xfb   :  { %114 = vst [vmem:[%s292_s3] sm:$0xff] %v106_v30 }

// kernel: language_model_forward.2
= control target key start
LH: loop header
LB: loop body
LE: loop exit
PB: predicated region body
PF: predicated region fallthrough
CT: control target
= control target key end

     0   :  { %v1522_v3 = vmov 0.0|0.0   ;;  %vm1523_vm0 = vmmov 0   ;;  %v1524_v4 = vmov 0.0   ;;  %s1880_s1 = inlined_call_operand.vmem [shape: f32[128,128], index: 1, kind: input, shape index: {}]   ;;  %s1881_s2 = inlined_call_operand.vmem [shape: f32[128,128], index: 2, kind: input, shape index: {}]   ;;  %s1882_s0 = inlined_call_operand.vmem [shape: f32[8,8,128], index: 0, kind: input, shape index: {}]   ;;  %s1883_s3 = inlined_call_operand.vmem [shape: f32[1,128], index: 3, kind: input, shape index: {}]   ;;  %s1884_s4 = inlined_call_operand.vmem [shape: f32[8,8,128], index: 4, kind: output, shape index: {}]  }
   0x1   :  { %v25_v0 = vld [vmem:[%s1880_s1] sm:$0xff]  ;;  %v26_v1 = vld [vmem:[%s1880_s1 + $0x8] sm:$0xff]  ;;  %v27_v2 = vld [vmem:[%s1880_s1 + $0x10] sm:$0xff]  ;;  %1311 = vmatprep.subr.bf16.mxu1 %v1522_v3  ;;  %1031 = vmatprep.mubr.msk.f32.mxu1 %vm1523_vm0, %v1524_v4 }
   0x2   :  { %v1279_v5 = vpack.c.bf16 %v26_v1, %v25_v0  ;;  %v28_v6 = vld [vmem:[%s1880_s1 + $0x18] sm:$0xff]  ;;  %v29_v7 = vld [vmem:[%s1880_s1 + $0x20] sm:$0xff]  ;;  %v30_v9 = vld [vmem:[%s1880_s1 + $0x28] sm:$0xff] }
   0x3   :  { %v1283_v8 = vpack.c.bf16 %v28_v6, %v27_v2  ;;  %v161_v10 = vld [vmem:[%s1881_s2] sm:$0xff]  ;;  %v162_v11 = vld [vmem:[%s1881_s2 + $0x8] sm:$0xff]  ;;  %v163_v13 = vld [vmem:[%s1881_s2 + $0x10] sm:$0xff]  ;;  %v1287_v15 = vpack.c.bf16 %v30_v9, %v29_v7 }
   0x4   :  { %1280 = vmatprep.subr.bf16.mxu0 %v1279_v5  ;;  %v1577_v12 = vpack.c.bf16 %v162_v11, %v161_v10  ;;  %v164_v14 = vld [vmem:[%s1881_s2 + $0x18] sm:$0xff]  ;;  %v31_v16 = vld [vmem:[%s1880_s1 + $0x30] sm:$0xff]  ;;  %v165_v19 = vld [vmem:[%s1881_s2 + $0x20] sm:$0xff] }
   0x5   :  { %1282 = vmatpush3.bf16.msra.mxu0 %v1279_v5  ;;  %v1589_v17 = vpack.c.bf16 %v164_v14, %v163_v13  ;;  %v32_v18 = vld [vmem:[%s1880_s1 + $0x38] sm:$0xff]  ;;  %v166_v20 = vld [vmem:[%s1881_s2 + $0x28] sm:$0xff]  ;;  %v17_v21 = vld [vmem:[%s1882_s0] sm:$0xff] }
   0x6   :  { %1284 = vmatprep.subr.bf16.mxu0 %v1283_v8  ;;  %1313 = vmatpush3.bf16.msra.mxu1 %v1577_v12  ;;  %v1291_v22 = vpack.c.bf16 %v32_v18, %v31_v16  ;;  %v33_v23 = vld [vmem:[%s1880_s1 + $0x40] sm:$0xff]  ;;  %v1608_v24 = vpack.c.bf16 %v166_v20, %v165_v19  ;;  %v34_v25 = vld [vmem:[%s1880_s1 + $0x48] sm:$0xff]  ;;  %v167_v26 = vld [vmem:[%s1881_s2 + $0x30] sm:$0xff] }
   0x7   :  { %1314 = vmatprep.subr.bf16.mxu1 %v1522_v3  ;;  %v168_v27 = vld [vmem:[%s1881_s2 + $0x38] sm:$0xff]  ;;  %987 = vmatprep.mubr.f32.mxu0 %v17_v21  ;;  %v1295_v28 = vpack.c.bf16 %v34_v25, %v33_v23  ;;  %v35_v29 = vld [vmem:[%s1880_s1 + $0x50] sm:$0xff]  ;;  %v169_v32 = vld [vmem:[%s1881_s2 + $0x40] sm:$0xff] }
   0x8   :  { %v1624_v30 = vpack.c.bf16 %v168_v27, %v167_v26  ;;  %v36_v31 = vld [vmem:[%s1880_s1 + $0x58] sm:$0xff]  ;;  %v170_v33 = vld [vmem:[%s1881_s2 + $0x48] sm:$0xff]  ;;  %v37_v35 = vld [vmem:[%s1880_s1 + $0x60] sm:$0xff] }
   0x9   :  { %1286 = vmatpush3.bf16.msra.mxu0 %v1283_v8  ;;  %v1299_v34 = vpack.c.bf16 %v36_v31, %v35_v29  ;;  %v1640_v36 = vpack.c.bf16 %v170_v33, %v169_v32  ;;  %v38_v37 = vld [vmem:[%s1880_s1 + $0x68] sm:$0xff]  ;;  %v171_v38 = vld [vmem:[%s1881_s2 + $0x50] sm:$0xff]  ;;  %v172_v39 = vld [vmem:[%s1881_s2 + $0x58] sm:$0xff] }
   0xa   :  { %1288 = vmatprep.subr.bf16.mxu0 %v1287_v15  ;;  %1316 = vmatpush3.bf16.msra.mxu1 %v1589_v17  ;;  %v1303_v40 = vpack.c.bf16 %v38_v37, %v37_v35  ;;  %v39_v41 = vld [vmem:[%s1880_s1 + $0x70] sm:$0xff]  ;;  %v1656_v42 = vpack.c.bf16 %v172_v39, %v171_v38  ;;  %v40_v43 = vld [vmem:[%s1880_s1 + $0x78] sm:$0xff]  ;;  %v173_v44 = vld [vmem:[%s1881_s2 + $0x60] sm:$0xff] }
   0xb   :  { %1317 = vmatprep.subr.bf16.mxu1 %v1522_v3  ;;  %v174_v45 = vld [vmem:[%s1881_s2 + $0x68] sm:$0xff]  ;;  %v1307_v46 = vpack.c.bf16 %v40_v43, %v39_v41  ;;  %v175_v48 = vld [vmem:[%s1881_s2 + $0x70] sm:$0xff]  ;;  %v176_v49 = vld [vmem:[%s1881_s2 + $0x78] sm:$0xff] }
   0xc   :  { %v1669_v47 = vpack.c.bf16 %v174_v45, %v173_v44  ;;  %v1679_v50 = vpack.c.bf16 %v176_v49, %v175_v48  ;;  %v18_v51 = vld [vmem:[%s1882_s0 + $0x8] sm:$0xff]  ;;  %v19_v52 = vld [vmem:[%s1882_s0 + $0x10] sm:$0xff]  ;;  %v20_v53 = vld [vmem:[%s1882_s0 + $0x18] sm:$0xff] }
   0xd   :  { %1290 = vmatpush3.bf16.msra.mxu0 %v1287_v15  ;;  %v21_v54 = vld [vmem:[%s1882_s0 + $0x20] sm:$0xff]  ;;  %v22_v55 = vld [vmem:[%s1882_s0 + $0x28] sm:$0xff]  ;;  %v23_v56 = vld [vmem:[%s1882_s0 + $0x30] sm:$0xff] }
   0xe   :  { %1292 = vmatprep.subr.bf16.mxu0 %v1291_v22  ;;  %1319 = vmatpush3.bf16.msra.mxu1 %v1608_v24  ;;  %v24_v57 = vld [vmem:[%s1882_s0 + $0x38] sm:$0xff]  ;;  %v1746_v58 = vld [vmem:[%s1883_s3] ss:$0 sm:$0xff] }
   0xf   :  { %1320 = vmatprep.subr.bf16.mxu1 %v1522_v3 }
  0x11   :  { %1294 = vmatpush3.bf16.msra.mxu0 %v1291_v22 }
  0x12   :  { %1296 = vmatprep.subr.bf16.mxu0 %v1295_v28  ;;  %1322 = vmatpush3.bf16.msra.mxu1 %v1624_v30 }
  0x13   :  { %1323 = vmatprep.subr.bf16.mxu1 %v1522_v3 }
  0x15   :  { %1298 = vmatpush3.bf16.msra.mxu0 %v1295_v28 }
  0x16   :  { %1300 = vmatprep.subr.bf16.mxu0 %v1299_v34  ;;  %1325 = vmatpush3.bf16.msra.mxu1 %v1640_v36 }
  0x17   :  { %1326 = vmatprep.subr.bf16.mxu1 %v1522_v3 }
  0x19   :  { %1302 = vmatpush3.bf16.msra.mxu0 %v1299_v34 }
  0x1a   :  { %1304 = vmatprep.subr.bf16.mxu0 %v1303_v40  ;;  %1328 = vmatpush3.bf16.msra.mxu1 %v1656_v42 }
  0x1b   :  { %1329 = vmatprep.subr.bf16.mxu1 %v1522_v3 }
  0x1d   :  { %1306 = vmatpush3.bf16.msra.mxu0 %v1303_v40 }
  0x1e   :  { %1308 = vmatprep.subr.bf16.mxu0 %v1307_v46  ;;  %1331 = vmatpush3.bf16.msra.mxu1 %v1669_v47 }
  0x1f   :  { %1332 = vmatprep.subr.bf16.mxu1 %v1522_v3 }
  0x21   :  { %1310 = vmatpush3.bf16.msra.mxu0 %v1307_v46 }
  0x22   :  { %1334 = vmatpush3.bf16.msra.mxu1 %v1679_v50  ;;  %1335 = vmatprep.subr.bf16.mxu0 %v1522_v3 }
  0x23   :  { %1359 = vmatprep.subr.bf16.mxu1 %v1522_v3 }
  0x24   :  { %988 = vmatmul.mubr.f32.vlgmr.msra.gmra.mrb[0].mxu0 %v18_v51 }
  0x25   :  { %1032 = vmatmul.mubr.f32.vlgmr.msra.gmra.mrb[0].mxu1 %v1524_v4  ;;  %1337 = vmatpush3.bf16.msra.mxu0 %v1577_v12 }
  0x26   :  { %1338 = vmatprep.subr.bf16.mxu0 %v1522_v3  ;;  %1361 = vmatpush3.bf16.msra.mxu1 %v1577_v12 }
  0x27   :  { %1362 = vmatprep.subr.bf16.mxu1 %v1522_v3  ;;  %1101 = vmatprep.mubr.msk.f32.mxu1 %vm1523_vm0, %v1524_v4 }
  0x28   :  { %990 = vmatprep.mubr.f32.mxu0 %v19_v52 }
  0x29   :  { %1340 = vmatpush3.bf16.msra.mxu0 %v1589_v17 }
  0x2a   :  { %1341 = vmatprep.subr.bf16.mxu0 %v1522_v3  ;;  %1364 = vmatpush3.bf16.msra.mxu1 %v1589_v17 }
  0x2b   :  { %1365 = vmatprep.subr.bf16.mxu1 %v1522_v3  ;;  %991 = vmatmul.mubr.f32.gmra.mrb[2].mxu0 %v20_v53 }
  0x2c   :  { %993 = vmatprep.mubr.f32.mxu0 %v21_v54 }
  0x2d   :  { %1343 = vmatpush3.bf16.msra.mxu0 %v1608_v24 }
  0x2e   :  { %1344 = vmatprep.subr.bf16.mxu0 %v1522_v3  ;;  %1367 = vmatpush3.bf16.msra.mxu1 %v1608_v24 }
  0x2f   :  { %1368 = vmatprep.subr.bf16.mxu1 %v1522_v3  ;;  %994 = vmatmul.mubr.f32.gmra.mrb[4].mxu0 %v22_v55 }
  0x30   :  { %996 = vmatprep.mubr.f32.mxu0 %v23_v56 }
  0x31   :  { %1346 = vmatpush3.bf16.msra.mxu0 %v1624_v30 }
  0x32   :  { %1347 = vmatprep.subr.bf16.mxu0 %v1522_v3  ;;  %1370 = vmatpush3.bf16.msra.mxu1 %v1624_v30 }
  0x33   :  { %1371 = vmatprep.subr.bf16.mxu1 %v1522_v3  ;;  %997 = vmatmul.mubr.f32.gmra.mrb[6].mxu0 %v24_v57 }
  0x34   :  { %1066 = vmatprep.mubr.msk.f32.mxu0 %vm1523_vm0, %v1524_v4 }
  0x35   :  { %1349 = vmatpush3.bf16.msra.mxu0 %v1640_v36 }
  0x36   :  { %1350 = vmatprep.subr.bf16.mxu0 %v1522_v3  ;;  %1373 = vmatpush3.bf16.msra.mxu1 %v1640_v36 }
  0x37   :  { %1374 = vmatprep.subr.bf16.mxu1 %v1522_v3 }
  0x39   :  { %1352 = vmatpush3.bf16.msra.mxu0 %v1656_v42 }
  0x3a   :  { %1353 = vmatprep.subr.bf16.mxu0 %v1522_v3  ;;  %1376 = vmatpush3.bf16.msra.mxu1 %v1656_v42 }
  0x3b   :  { %1377 = vmatprep.subr.bf16.mxu1 %v1522_v3 }
  0x3d   :  { %1355 = vmatpush3.bf16.msra.mxu0 %v1669_v47 }
  0x3e   :  { %1356 = vmatprep.subr.bf16.mxu0 %v1522_v3  ;;  %1379 = vmatpush3.bf16.msra.mxu1 %v1669_v47 }
  0x3f   :  { %1380 = vmatprep.subr.bf16.mxu1 %v1522_v3 }
  0x41   :  { %1358 = vmatpush3.bf16.msra.mxu0 %v1679_v50 }
  0x42   :  { %1382 = vmatpush3.bf16.msra.mxu1 %v1679_v50  ;;  %1383 = vmatprep.subr.bf16.mxu0 %v1522_v3 }
  0x43   :  { %1407 = vmatprep.subr.bf16.mxu1 %v1522_v3 }
  0xf7   :  { %v989_v59 = vpop.f32.mrb[0].mxu0 }
  0xf8   :  { %v114_v60 = vpop.f32.mrb[1].mxu0  ;;  %v244_v61 = vpop.f32.mrb[0].mxu1  ;;  %v120_v10 = vadd.f32 %v989_v59, %v1746_v58 }
  0xf9   :  { %v115_v62 = vadd.f32 %v1746_v58, %v114_v60  ;;  %v1033_v63 = vpop.f32.mrb[1].mxu1 }
  0xfb   :  { %v248_v0 = vadd.f32 %v244_v61, %v115_v62 }
  0xfd   :  { %1506 = vtanh.f32 %v248_v0 }
  0xfe   :  { %v992_v2 = vpop.f32.mrb[2].mxu0 }
  0xff   :  { %v124_v5 = vpop.f32.mrb[3].mxu0  ;;  %v130_v22 = vadd.f32 %v992_v2, %v1746_v58 }
 0x100   :  { %v125_v16 = vadd.f32 %v1746_v58, %v124_v5 }
 0x102   :  { %v1770_v6 = vpop.f32.mrb[4].mxu0 }
 0x103   :  { %v1772_v7 = vpop.f32.mrb[5].mxu0 }
 0x104   :  { %v135_v28 = vadd.f32 %v1746_v58, %v1772_v7 }
 0x106   :  { %v1774_v8 = vpop.f32.mrb[6].mxu0 }
 0x107   :  { %v1507_v1 = vpop.eup %1506  ;;  %v1776_v9 = vpop.f32.mrb[7].mxu0  ;;  %v150_v38 = vadd.f32 %v1774_v8, %v1746_v58 }
 0x108   :  { %250 = vst [vmem:[%s1884_s4] sm:$0xff] %v1507_v1  ;;  %1067 = vmatmul.mubr.f32.vlgmr.msra.gmra.mrb[8].mxu0 %v1507_v1  ;;  %v145_v34 = vadd.f32 %v1746_v58, %v1776_v9 }
 0x109   :  { %1385 = vmatpush3.bf16.msra.mxu0 %v1577_v12  ;;  %1136 = vmatprep.mubr.msk.f32.mxu0 %vm1523_vm0, %v1524_v4 }
 0x10a   :  { %1386 = vmatprep.subr.bf16.mxu0 %v1522_v3 }
 0x10d   :  { %1388 = vmatpush3.bf16.msra.mxu0 %v1589_v17 }
 0x10e   :  { %1389 = vmatprep.subr.bf16.mxu0 %v1522_v3 }
 0x111   :  { %1391 = vmatpush3.bf16.msra.mxu0 %v1608_v24 }
 0x112   :  { %1392 = vmatprep.subr.bf16.mxu0 %v1522_v3 }
 0x115   :  { %1394 = vmatpush3.bf16.msra.mxu0 %v1624_v30 }
 0x116   :  { %1395 = vmatprep.subr.bf16.mxu0 %v1522_v3 }
 0x119   :  { %1397 = vmatpush3.bf16.msra.mxu0 %v1640_v36 }
 0x11a   :  { %1398 = vmatprep.subr.bf16.mxu0 %v1522_v3 }
 0x11d   :  { %1400 = vmatpush3.bf16.msra.mxu0 %v1656_v42 }
 0x11e   :  { %1401 = vmatprep.subr.bf16.mxu0 %v1522_v3 }
 0x121   :  { %1403 = vmatpush3.bf16.msra.mxu0 %v1669_v47 }
 0x122   :  { %1404 = vmatprep.subr.bf16.mxu0 %v1522_v3 }
 0x125   :  { %1406 = vmatpush3.bf16.msra.mxu0 %v1679_v50 }
 0x126   :  { %1431 = vmatprep.subr.bf16.mxu0 %v1522_v3 }
 0x1db   :  { %v319_v11 = vpop.f32.mrb[8].mxu0 }
 0x1dc   :  { %v323_v13 = vadd.f32 %v319_v11, %v120_v10  ;;  %v1068_v14 = vpop.f32.mrb[9].mxu0 }
 0x1de   :  { %1508 = vtanh.f32 %v323_v13 }
 0x1e8   :  { %v1509_v15 = vpop.eup %1508 }
 0x1e9   :  { %782 = vst [vmem:[%s1884_s4 + $0x8] sm:$0xff] %v1509_v15  ;;  %1102 = vmatmul.mubr.f32.vlgmr.msra.gmra.mrb[2].mxu1 %v1509_v15 }
 0x1ea   :  { %1409 = vmatpush3.bf16.msra.mxu1 %v1577_v12  ;;  %1171 = vmatprep.mubr.msk.f32.mxu1 %vm1523_vm0, %v1524_v4 }
 0x1eb   :  { %1410 = vmatprep.subr.bf16.mxu1 %v1522_v3 }
 0x1ee   :  { %1412 = vmatpush3.bf16.msra.mxu1 %v1589_v17 }
 0x1ef   :  { %1413 = vmatprep.subr.bf16.mxu1 %v1522_v3 }
 0x1f2   :  { %1415 = vmatpush3.bf16.msra.mxu1 %v1608_v24 }
 0x1f3   :  { %1416 = vmatprep.subr.bf16.mxu1 %v1522_v3 }
 0x1f6   :  { %1418 = vmatpush3.bf16.msra.mxu1 %v1624_v30 }
 0x1f7   :  { %1419 = vmatprep.subr.bf16.mxu1 %v1522_v3 }
 0x1fa   :  { %1421 = vmatpush3.bf16.msra.mxu1 %v1640_v36 }
 0x1fb   :  { %1422 = vmatprep.subr.bf16.mxu1 %v1522_v3 }
 0x1fe   :  { %1424 = vmatpush3.bf16.msra.mxu1 %v1656_v42 }
 0x1ff   :  { %1425 = vmatprep.subr.bf16.mxu1 %v1522_v3 }
 0x202   :  { %1427 = vmatpush3.bf16.msra.mxu1 %v1669_v47 }
 0x203   :  { %1428 = vmatprep.subr.bf16.mxu1 %v1522_v3 }
 0x206   :  { %1430 = vmatpush3.bf16.msra.mxu1 %v1679_v50 }
 0x207   :  { %1455 = vmatprep.subr.bf16.mxu1 %v1522_v3 }
 0x2bc   :  { %v394_v18 = vpop.f32.mrb[2].mxu1 }
 0x2bd   :  { %v398_v19 = vadd.f32 %v394_v18, %v125_v16  ;;  %v1103_v20 = vpop.f32.mrb[3].mxu1 }
 0x2bf   :  { %1510 = vtanh.f32 %v398_v19 }
 0x2c9   :  { %v1511_v21 = vpop.eup %1510 }
 0x2ca   :  { %784 = vst [vmem:[%s1884_s4 + $0x10] sm:$0xff] %v1511_v21  ;;  %1137 = vmatmul.mubr.f32.vlgmr.msra.gmra.mrb[10].mxu0 %v1511_v21 }
 0x2cb   :  { %1433 = vmatpush3.bf16.msra.mxu0 %v1577_v12  ;;  %1206 = vmatprep.mubr.msk.f32.mxu0 %vm1523_vm0, %v1524_v4 }
 0x2cc   :  { %1434 = vmatprep.subr.bf16.mxu0 %v1522_v3 }
 0x2cf   :  { %1436 = vmatpush3.bf16.msra.mxu0 %v1589_v17 }
 0x2d0   :  { %1437 = vmatprep.subr.bf16.mxu0 %v1522_v3 }
 0x2d3   :  { %1439 = vmatpush3.bf16.msra.mxu0 %v1608_v24 }
 0x2d4   :  { %1440 = vmatprep.subr.bf16.mxu0 %v1522_v3 }
 0x2d7   :  { %1442 = vmatpush3.bf16.msra.mxu0 %v1624_v30 }
 0x2d8   :  { %1443 = vmatprep.subr.bf16.mxu0 %v1522_v3 }
 0x2db   :  { %1445 = vmatpush3.bf16.msra.mxu0 %v1640_v36 }
 0x2dc   :  { %1446 = vmatprep.subr.bf16.mxu0 %v1522_v3 }
 0x2df   :  { %1448 = vmatpush3.bf16.msra.mxu0 %v1656_v42 }
 0x2e0   :  { %1449 = vmatprep.subr.bf16.mxu0 %v1522_v3 }
 0x2e3   :  { %1451 = vmatpush3.bf16.msra.mxu0 %v1669_v47 }
 0x2e4   :  { %1452 = vmatprep.subr.bf16.mxu0 %v1522_v3 }
 0x2e7   :  { %1454 = vmatpush3.bf16.msra.mxu0 %v1679_v50 }
 0x2e8   :  { %1479 = vmatprep.subr.bf16.mxu0 %v1522_v3 }
 0x39d   :  { %v469_v23 = vpop.f32.mrb[10].mxu0 }
 0x39e   :  { %v473_v25 = vadd.f32 %v469_v23, %v130_v22  ;;  %v1138_v26 = vpop.f32.mrb[11].mxu0 }
 0x3a0   :  { %1512 = vtanh.f32 %v473_v25 }
 0x3aa   :  { %v1513_v27 = vpop.eup %1512 }
 0x3ab   :  { %786 = vst [vmem:[%s1884_s4 + $0x18] sm:$0xff] %v1513_v27  ;;  %1172 = vmatmul.mubr.f32.vlgmr.msra.gmra.mrb[4].mxu1 %v1513_v27 }
 0x3ac   :  { %1457 = vmatpush3.bf16.msra.mxu1 %v1577_v12  ;;  %1241 = vmatprep.mubr.msk.f32.mxu1 %vm1523_vm0, %v1524_v4 }
 0x3ad   :  { %1458 = vmatprep.subr.bf16.mxu1 %v1522_v3 }
 0x3b0   :  { %1460 = vmatpush3.bf16.msra.mxu1 %v1589_v17 }
 0x3b1   :  { %1461 = vmatprep.subr.bf16.mxu1 %v1522_v3 }
 0x3b4   :  { %1463 = vmatpush3.bf16.msra.mxu1 %v1608_v24 }
 0x3b5   :  { %1464 = vmatprep.subr.bf16.mxu1 %v1522_v3 }
 0x3b8   :  { %1466 = vmatpush3.bf16.msra.mxu1 %v1624_v30 }
 0x3b9   :  { %1467 = vmatprep.subr.bf16.mxu1 %v1522_v3 }
 0x3bc   :  { %1469 = vmatpush3.bf16.msra.mxu1 %v1640_v36 }
 0x3bd   :  { %1470 = vmatprep.subr.bf16.mxu1 %v1522_v3 }
 0x3c0   :  { %1472 = vmatpush3.bf16.msra.mxu1 %v1656_v42 }
 0x3c1   :  { %1473 = vmatprep.subr.bf16.mxu1 %v1522_v3 }
 0x3c4   :  { %1475 = vmatpush3.bf16.msra.mxu1 %v1669_v47 }
 0x3c5   :  { %1476 = vmatprep.subr.bf16.mxu1 %v1522_v3 }
 0x3c8   :  { %1478 = vmatpush3.bf16.msra.mxu1 %v1679_v50 }
 0x47e   :  { %v544_v29 = vpop.f32.mrb[4].mxu1 }
 0x47f   :  { %v548_v31 = vadd.f32 %v544_v29, %v135_v28  ;;  %v1173_v32 = vpop.f32.mrb[5].mxu1 }
 0x481   :  { %1514 = vtanh.f32 %v548_v31 }
 0x48b   :  { %v1515_v33 = vpop.eup %1514 }
 0x48c   :  { %788 = vst [vmem:[%s1884_s4 + $0x20] sm:$0xff] %v1515_v33  ;;  %1207 = vmatmul.mubr.f32.vlgmr.msra.gmra.mrb[12].mxu0 %v1515_v33 }
 0x48d   :  { %1481 = vmatpush3.bf16.msra.mxu0 %v1577_v12  ;;  %1276 = vmatprep.mubr.msk.f32.mxu0 %vm1523_vm0, %v1524_v4  ;;  %v140_v4 = vadd.f32 %v1770_v6, %v1746_v58 }
 0x48e   :  { %1482 = vmatprep.subr.bf16.mxu0 %v1522_v3 }
 0x491   :  { %1484 = vmatpush3.bf16.msra.mxu0 %v1589_v17 }
 0x492   :  { %1485 = vmatprep.subr.bf16.mxu0 %v1522_v3 }
 0x495   :  { %1487 = vmatpush3.bf16.msra.mxu0 %v1608_v24 }
 0x496   :  { %1488 = vmatprep.subr.bf16.mxu0 %v1522_v3 }
 0x499   :  { %1490 = vmatpush3.bf16.msra.mxu0 %v1624_v30 }
 0x49a   :  { %1491 = vmatprep.subr.bf16.mxu0 %v1522_v3 }
 0x49d   :  { %1493 = vmatpush3.bf16.msra.mxu0 %v1640_v36 }
 0x49e   :  { %1494 = vmatprep.subr.bf16.mxu0 %v1522_v3 }
 0x4a1   :  { %1496 = vmatpush3.bf16.msra.mxu0 %v1656_v42 }
 0x4a2   :  { %1497 = vmatprep.subr.bf16.mxu0 %v1522_v3 }
 0x4a5   :  { %1499 = vmatpush3.bf16.msra.mxu0 %v1669_v47 }
 0x4a6   :  { %1500 = vmatprep.subr.bf16.mxu0 %v1522_v3 }
 0x4a9   :  { %1502 = vmatpush3.bf16.msra.mxu0 %v1679_v50 }
 0x55f   :  { %v619_v12 = vpop.f32.mrb[12].mxu0 }
 0x560   :  { %v623_v17 = vadd.f32 %v619_v12, %v140_v4  ;;  %v1208_v24 = vpop.f32.mrb[13].mxu0 }
 0x562   :  { %1516 = vtanh.f32 %v623_v17 }
 0x56c   :  { %v1517_v30 = vpop.eup %1516 }
 0x56d   :  { %790 = vst [vmem:[%s1884_s4 + $0x28] sm:$0xff] %v1517_v30  ;;  %1242 = vmatmul.mubr.f32.vlgmr.msra.gmra.mrb[6].mxu1 %v1517_v30 }
 0x640   :  { %v694_v35 = vpop.f32.mrb[6].mxu1 }
 0x641   :  { %v698_v3 = vadd.f32 %v694_v35, %v145_v34  ;;  %v1243_v36 = vpop.f32.mrb[7].mxu1 }
 0x643   :  { %1518 = vtanh.f32 %v698_v3 }
 0x64d   :  { %v1519_v37 = vpop.eup %1518 }
 0x64e   :  { %792 = vst [vmem:[%s1884_s4 + $0x30] sm:$0xff] %v1519_v37  ;;  %1277 = vmatmul.mubr.f32.vlgmr.msra.gmra.mrb[14].mxu0 %v1519_v37 }
 0x721   :  { %v769_v39 = vpop.f32.mrb[14].mxu0 }
 0x722   :  { %v773_v40 = vadd.f32 %v769_v39, %v150_v38  ;;  %v1278_v41 = vpop.f32.mrb[15].mxu0 }
 0x724   :  { %1520 = vtanh.f32 %v773_v40 }
 0x72e   :  { %v1521_v42 = vpop.eup %1520 }
 0x72f   :  { %794 = vst [vmem:[%s1884_s4 + $0x38] sm:$0xff] %v1521_v42 }

</bundles_post_ra>
